<compile_context>
chip_gen: v7x
topology: tpu7x:2x2x1
jax: 0.10.0
libtpu: 0.0.40
codegen_flags: <defaults>
</compile_context>

<pallas_src>
import math
import functools

import jax
import jax.numpy as jnp
from jax.experimental import pallas as pl
from jax.experimental.pallas import tpu as pltpu

_BF16 = jnp.bfloat16
_VMEM_LIMIT = 32 * 1024 * 1024  # explicit scoped-VMEM limit, safe on v5e/v6e/v7x


def _cp(dims):
    return pltpu.CompilerParams(dimension_semantics=dims,
                                vmem_limit_bytes=_VMEM_LIMIT)


def _tile(dim, target, mult):
    """Largest divisor of `dim` that is <= target and a multiple of `mult`; else full."""
    if dim <= target:
        return dim
    t = (target // mult) * mult
    while t >= mult:
        if dim % t == 0:
            return t
        t -= mult
    return dim


# ----------------------------- Pallas kernels -----------------------------

def _rms_scale_kernel(x_ref, o_ref, *, eps):
    x = x_ref[...].astype(jnp.float32)
    o_ref[...] = jax.lax.rsqrt(jnp.mean(x * x, axis=-1, keepdims=True) + eps)


def rms_scale(x2d, eps):
    M, D = x2d.shape
    tm = _tile(M, 256, 16)
    return pl.pallas_call(
        functools.partial(_rms_scale_kernel, eps=eps),
        out_shape=jax.ShapeDtypeStruct((M, 1), jnp.float32),
        grid=(M // tm,),
        in_specs=[pl.BlockSpec((tm, D), lambda i: (i, 0))],
        out_specs=pl.BlockSpec((tm, 1), lambda i: (i, 0)),
        compiler_params=_cp(("parallel",)),
    )(x2d)


def _qkv_rope_kernel(x_ref, sc_ref, g_ref, w_ref, cos_ref, sin_ref,
                     q_ref, k_ref, v_ref, acc_ref, *, D):
    kk = pl.program_id(1)

    @pl.when(kk == 0)
    def _():
        acc_ref[...] = jnp.zeros_like(acc_ref)

    # RMSNorm fused: per-row 1/rms (precomputed) * gamma, in f32, then bf16 for MXU.
    xn = (x_ref[...] * sc_ref[...]) * g_ref[...]
    acc_ref[...] += jnp.dot(xn.astype(_BF16), w_ref[...],
                            preferred_element_type=jnp.float32)

    @pl.when(kk == pl.num_programs(1) - 1)
    def _():
        Dh = D // 2
        c = cos_ref[...]
        s = sin_ref[...]

        # q/k sections are in a half-split layout ([all "real" halves | all
        # "imag" halves]) so RoPE is a lane-dense rotate-half on the full row.
        def rope_store(base, out_ref):
            x1 = acc_ref[:, base:base + Dh]
            x2 = acc_ref[:, base + Dh:base + 2 * Dh]
            out_ref[:, :Dh] = (x1 * c - x2 * s).astype(out_ref.dtype)
            out_ref[:, Dh:] = (x1 * s + x2 * c).astype(out_ref.dtype)

        rope_store(0, q_ref)
        rope_store(D, k_ref)
        v_ref[...] = acc_ref[:, 2 * D:3 * D].astype(v_ref.dtype)


def qkv_rope_proj(x2d, inv_rms, gamma, wqkv, cos_rows, sin_rows, D):
    M, K = x2d.shape
    N = wqkv.shape[1]          # 3 * D
    Dh = D // 2
    tm = _tile(M, 256, 16)
    tk = _tile(K, 512, 128)
    # TODO(synk): for very large D the 3D-wide output/accumulator should also be
    # tiled along N (at head-group granularity so the RoPE epilogue stays local).
    return pl.pallas_call(
        functools.partial(_qkv_rope_kernel, D=D),
        out_shape=(jax.ShapeDtypeStruct((M, D), _BF16),
                   jax.ShapeDtypeStruct((M, D), _BF16),
                   jax.ShapeDtypeStruct((M, D), _BF16)),
        grid=(M // tm, K // tk),
        in_specs=[pl.BlockSpec((tm, tk), lambda i, k: (i, k)),   # x
                  pl.BlockSpec((tm, 1), lambda i, k: (i, 0)),    # 1/rms
                  pl.BlockSpec((1, tk), lambda i, k: (0, k)),    # attn_norm gamma
                  pl.BlockSpec((tk, N), lambda i, k: (k, 0)),    # wqkv (bf16)
                  pl.BlockSpec((tm, Dh), lambda i, k: (i, 0)),   # cos rows
                  pl.BlockSpec((tm, Dh), lambda i, k: (i, 0))],  # sin rows
        out_specs=(pl.BlockSpec((tm, D), lambda i, k: (i, 0)),
                   pl.BlockSpec((tm, D), lambda i, k: (i, 0)),
                   pl.BlockSpec((tm, D), lambda i, k: (i, 0))),
        scratch_shapes=[pltpu.VMEM((tm, N), jnp.float32)],
        compiler_params=_cp(("parallel", "arbitrary")),
    )(x2d, inv_rms, gamma, wqkv, cos_rows, sin_rows)


def _flash_attn_kernel(q_ref, k_ref, v_ref, o_ref, m_sc, l_sc, acc_sc, *,
                       scale, causal, start_pos):
    ki = pl.program_id(2)

    @pl.when(ki == 0)
    def _():
        m_sc[...] = jnp.full_like(m_sc, -1e30)
        l_sc[...] = jnp.zeros_like(l_sc)
        acc_sc[...] = jnp.zeros_like(acc_sc)

    q = q_ref[...]
    k = k_ref[...]
    s = jnp.einsum('gqd,gkd->gqk', q, k,
                   preferred_element_type=jnp.float32) * scale
    if causal:
        tq = q.shape[1]
        tkv = k.shape[1]
        q_pos = pl.program_id(1) * tq + jax.lax.broadcasted_iota(
            jnp.int32, (tq, tkv), 0)
        k_pos = ki * tkv + jax.lax.broadcasted_iota(jnp.int32, (tq, tkv), 1)
        s = jnp.where((k_pos <= q_pos + start_pos)[None, :, :], s, -jnp.inf)

    m_prev = m_sc[...]
    m_new = jnp.maximum(m_prev, s.max(axis=-1, keepdims=True))
    alpha = jnp.exp(m_prev - m_new)
    p = jnp.exp(s - m_new)
    l_sc[...] = alpha * l_sc[...] + p.sum(axis=-1, keepdims=True)
    acc_sc[...] = alpha * acc_sc[...] + jnp.einsum(
        'gqk,gkd->gqd', p.astype(v_ref.dtype), v_ref[...],
        preferred_element_type=jnp.float32)
    m_sc[...] = m_new

    @pl.when(ki == pl.num_programs(2) - 1)
    def _():
        o_ref[...] = (acc_sc[...] * pl.reciprocal(l_sc[...], approx=True)
                      ).astype(o_ref.dtype)


def flash_attention(q, k, v, scale, causal, start_pos):
    BH, S, Hd = q.shape
    Skv = k.shape[1]
    G = _tile(BH, 4, 1)          # heads per grid step (better MXU fill)
    tq = _tile(S, 256, 16)
    tkv = _tile(Skv, 512, 128)
    return pl.pallas_call(
        functools.partial(_flash_attn_kernel, scale=scale, causal=causal,
                          start_pos=start_pos),
        out_shape=jax.ShapeDtypeStruct((BH, S, Hd), _BF16),
        grid=(BH // G, S // tq, Skv // tkv),
        in_specs=[pl.BlockSpec((G, tq, Hd), lambda g, qi, ki: (g, qi, 0)),
                  pl.BlockSpec((G, tkv, Hd), lambda g, qi, ki: (g, ki, 0)),
                  pl.BlockSpec((G, tkv, Hd), lambda g, qi, ki: (g, ki, 0))],
        out_specs=pl.BlockSpec((G, tq, Hd), lambda g, qi, ki: (g, qi, 0)),
        scratch_shapes=[pltpu.VMEM((G, tq, 1), jnp.float32),
                        pltpu.VMEM((G, tq, 1), jnp.float32),
                        pltpu.VMEM((G, tq, Hd), jnp.float32)],
        compiler_params=_cp(("parallel", "parallel", "arbitrary")),
    )(q, k, v)


def _linear_res_kernel(x_ref, w_ref, r_ref, o_ref, acc_ref):
    kk = pl.program_id(2)

    @pl.when(kk == 0)
    def _():
        acc_ref[...] = jnp.zeros_like(acc_ref)

    acc_ref[...] += jnp.dot(x_ref[...], w_ref[...],
                            preferred_element_type=jnp.float32)

    @pl.when(kk == pl.num_programs(2) - 1)
    def _():
        o_ref[...] = (acc_ref[...] + r_ref[...]).astype(o_ref.dtype)


def linear_residual(x2d, w, res):
    M, K = x2d.shape
    N = w.shape[1]
    tm = _tile(M, 256, 16)
    tn = _tile(N, 512, 128)
    tk = _tile(K, 512, 128)
    return pl.pallas_call(
        _linear_res_kernel,
        out_shape=jax.ShapeDtypeStruct((M, N), jnp.float32),
        grid=(M // tm, N // tn, K // tk),
        in_specs=[pl.BlockSpec((tm, tk), lambda i, j, k: (i, k)),
                  pl.BlockSpec((tk, tn), lambda i, j, k: (k, j)),
                  pl.BlockSpec((tm, tn), lambda i, j, k: (i, j))],
        out_specs=pl.BlockSpec((tm, tn), lambda i, j, k: (i, j)),
        scratch_shapes=[pltpu.VMEM((tm, tn), jnp.float32)],
        compiler_params=_cp(("parallel", "parallel", "arbitrary")),
    )(x2d, w, res)


def _norm_linear_kernel(x_ref, sc_ref, g_ref, w_ref, o_ref, acc_ref):
    kk = pl.program_id(2)

    @pl.when(kk == 0)
    def _():
        acc_ref[...] = jnp.zeros_like(acc_ref)

    xn = (x_ref[...] * sc_ref[...]) * g_ref[...]
    acc_ref[...] += jnp.dot(xn.astype(_BF16), w_ref[...],
                            preferred_element_type=jnp.float32)

    @pl.when(kk == pl.num_programs(2) - 1)
    def _():
        o_ref[...] = acc_ref[...].astype(o_ref.dtype)


def norm_linear(x2d, inv_rms, gamma, w):
    M, K = x2d.shape
    N = w.shape[1]
    tm = _tile(M, 256, 16)
    tn = _tile(N, 512, 128)
    tk = _tile(K, 512, 128)
    return pl.pallas_call(
        _norm_linear_kernel,
        out_shape=jax.ShapeDtypeStruct((M, N), jnp.float32),
        grid=(M // tm, N // tn, K // tk),
        in_specs=[pl.BlockSpec((tm, tk), lambda i, j, k: (i, k)),
                  pl.BlockSpec((tm, 1), lambda i, j, k: (i, 0)),
                  pl.BlockSpec((1, tk), lambda i, j, k: (0, k)),
                  pl.BlockSpec((tk, tn), lambda i, j, k: (k, j))],
        out_specs=pl.BlockSpec((tm, tn), lambda i, j, k: (i, j)),
        scratch_shapes=[pltpu.VMEM((tm, tn), jnp.float32)],
        compiler_params=_cp(("parallel", "parallel", "arbitrary")),
    )(x2d, inv_rms, gamma, w)


def _ffn_kernel(x_ref, sc_ref, g_ref, w1_ref, w3_ref, w2_ref, o_ref, acc_ref):
    t = pl.program_id(1)

    @pl.when(t == 0)
    def _():
        acc_ref[...] = jnp.zeros_like(acc_ref)

    xn = ((x_ref[...] * sc_ref[...]) * g_ref[...]).astype(_BF16)
    h1 = jnp.dot(xn, w1_ref[...], preferred_element_type=jnp.float32)
    h3 = jnp.dot(xn, w3_ref[...], preferred_element_type=jnp.float32)
    gate = (h1 * jax.nn.sigmoid(h1)) * h3          # SiLU gate in f32
    acc_ref[...] += jnp.dot(gate.astype(_BF16), w2_ref[...],
                            preferred_element_type=jnp.float32)

    @pl.when(t == pl.num_programs(1) - 1)
    def _():
        o_ref[...] = (x_ref[...] + acc_ref[...]).astype(o_ref.dtype)   # + residual


def feed_forward(x2d, inv_rms, gamma, w1, w3, w2):
    M, D = x2d.shape
    Hh = w1.shape[1]
    tm = _tile(M, 256, 16)
    th = _tile(Hh, 512, 128)
    return pl.pallas_call(
        _ffn_kernel,
        out_shape=jax.ShapeDtypeStruct((M, D), jnp.float32),
        grid=(M // tm, Hh // th),
        in_specs=[pl.BlockSpec((tm, D), lambda i, t: (i, 0)),
                  pl.BlockSpec((tm, 1), lambda i, t: (i, 0)),
                  pl.BlockSpec((1, D), lambda i, t: (0, 0)),
                  pl.BlockSpec((D, th), lambda i, t: (0, t)),
                  pl.BlockSpec((D, th), lambda i, t: (0, t)),
                  pl.BlockSpec((th, D), lambda i, t: (t, 0))],
        out_specs=pl.BlockSpec((tm, D), lambda i, t: (i, 0)),
        scratch_shapes=[pltpu.VMEM((tm, D), jnp.float32)],
        compiler_params=_cp(("parallel", "arbitrary")),
    )(x2d, inv_rms, gamma, w1, w3, w2)


# ----------------------------- model glue -----------------------------

def precompute_freqs(dim, end, theta=10000.0):
    freqs = 1.0 / (theta ** (jnp.arange(0, dim, 2)[: dim // 2].astype(jnp.float32) / dim))
    t = jnp.arange(end, dtype=jnp.float32)
    ang = jnp.outer(t, freqs)
    return jnp.cos(ang), jnp.sin(ang)


def init_params(key, cfg):
    D, V, Hdim, L = cfg['dim'], cfg['vocab_size'], cfg['hidden_dim'], cfg['n_layers']
    keys = jax.random.split(key, 2 + 7 * L)

    def w(k, shape):
        return 0.02 * jax.random.normal(k, shape, jnp.float32)

    params = {
        'emb': w(keys[0], (V, D)),
        'norm': jnp.ones((D,), jnp.float32),
        'output': w(keys[1], (D, V)),
        'layers': [],
    }
    idx = 2
    for _ in range(L):
        params['layers'].append({
            'attn_norm': jnp.ones((D,), jnp.float32),
            'ffn_norm': jnp.ones((D,), jnp.float32),
            'wq': w(keys[idx + 0], (D, D)),
            'wk': w(keys[idx + 1], (D, D)),
            'wv': w(keys[idx + 2], (D, D)),
            'wo': w(keys[idx + 3], (D, D)),
            'w1': w(keys[idx + 4], (D, Hdim)),
            'w3': w(keys[idx + 5], (D, Hdim)),
            'w2': w(keys[idx + 6], (Hdim, D)),
        })
        idx += 7
    cos, sin = precompute_freqs(D // cfg['n_heads'], cfg['max_seq_len'] * 2)
    params['freqs_cos'] = cos
    params['freqs_sin'] = sin
    return params


def prep_params(params, cfg):
    """Pack / permute / cast weights once for the Pallas forward path."""
    D, H = cfg['dim'], cfg['n_heads']
    Hd = D // H
    hp = Hd // 2
    # Permute wq/wk output columns from interleaved (re, im, re, im, ...) per head
    # to a global half-split layout [all real halves | all imag halves]; the
    # per-head q.k dot product is invariant, and RoPE becomes a lane-dense
    # rotate-half inside the QKV kernel.
    heads = jnp.arange(H)
    freqs = jnp.arange(hp)
    even = (heads[:, None] * Hd + 2 * freqs[None, :]).reshape(-1)
    perm = jnp.concatenate([even, even + 1])

    prepped = {
        'emb': params['emb'],
        'norm': params['norm'].reshape(1, D),
        'out_w': params['output'].astype(_BF16),
        'freqs_cos': params['freqs_cos'],
        'freqs_sin': params['freqs_sin'],
        'layers': [],
    }
    for lp in params['layers']:
        prepped['layers'].append({
            'attn_norm': lp['attn_norm'].reshape(1, D),
            'ffn_norm': lp['ffn_norm'].reshape(1, D),
            'wqkv': jnp.concatenate(
                [lp['wq'][:, perm], lp['wk'][:, perm], lp['wv']],
                axis=1).astype(_BF16),
            'wo': lp['wo'].astype(_BF16),
            'w1': lp['w1'].astype(_BF16),
            'w3': lp['w3'].astype(_BF16),
            'w2': lp['w2'].astype(_BF16),
        })
    return prepped


def transformer_block_forward(h, lp, cos_rows, sin_rows, cfg, causal, start_pos):
    B, S, D = h.shape
    H = cfg['n_heads']
    Hd = D // H
    hp = Hd // 2
    M = B * S
    x2 = h.reshape(M, D)

    # --- attention sub-block: fused RMSNorm + QKV + RoPE ---
    inv_rms = rms_scale(x2, cfg['norm_eps'])
    q, k, v = qkv_rope_proj(x2, inv_rms, lp['attn_norm'], lp['wqkv'],
                            cos_rows, sin_rows, D)

    # Regroup per head for attention (single XLA transpose each).  q/k carry the
    # half-split layout written by the kernel; v is in the standard layout.
    def split_heads_halved(t):
        return (t.reshape(B, S, 2, H, hp).transpose(0, 3, 1, 2, 4)
                 .reshape(B * H, S, Hd))

    def split_heads(t):
        return t.reshape(B, S, H, Hd).transpose(0, 2, 1, 3).reshape(B * H, S, Hd)

    qh = split_heads_halved(q)
    kh = split_heads_halved(k)
    vh = split_heads(v)

    # n_kv_heads == n_heads (n_rep == 1); with start_pos == 0 the KV-cache slice
    # equals the freshly produced keys/values, so use them directly.
    # TODO(synk): stateful KV-cache writeback / start_pos > 0 decoding not modeled.
    o = flash_attention(qh, kh, vh, 1.0 / math.sqrt(Hd), causal, start_pos)
    o2 = o.reshape(B, H, S, Hd).transpose(0, 2, 1, 3).reshape(M, D)

    h2 = linear_residual(o2, lp['wo'], x2)                     # h + attn_out @ wo

    # --- FFN sub-block: fused RMSNorm + SwiGLU + residual ---
    inv_rms2 = rms_scale(h2, cfg['norm_eps'])
    h3 = feed_forward(h2, inv_rms2, lp['ffn_norm'], lp['w1'], lp['w3'], lp['w2'])
    return h3.reshape(B, S, D)


def transformer_column_forward(tokens, start_pos, prepped, cfg, lateral_inputs=None):
    B, S = tokens.shape
    D, V, H = cfg['dim'], cfg['vocab_size'], cfg['n_heads']
    hp = (D // H) // 2
    M = B * S

    h = prepped['emb'][tokens]                                 # embedding gather (XLA glue)
    cos = prepped['freqs_cos'][start_pos:start_pos + S]        # (S, Hd//2)
    sin = prepped['freqs_sin'][start_pos:start_pos + S]
    # Per-row cos/sin tiled across heads for the half-split layout: small (M, D//2).
    cos_rows = jnp.broadcast_to(jnp.tile(cos, (1, H))[None], (B, S, H * hp)).reshape(M, H * hp)
    sin_rows = jnp.broadcast_to(jnp.tile(sin, (1, H))[None], (B, S, H * hp)).reshape(M, H * hp)

    causal = S > 1
    layer_outputs = []
    for i, lp in enumerate(prepped['layers']):
        if lateral_inputs is not None and i < len(lateral_inputs):
            h = h + lateral_inputs[i]
        h = transformer_block_forward(h, lp, cos_rows, sin_rows, cfg, causal, start_pos)
        layer_outputs.append(h)

    inv_rms = rms_scale(h.reshape(M, D), cfg['norm_eps'])
    logits = norm_linear(h.reshape(M, D), inv_rms, prepped['norm'],
                         prepped['out_w']).reshape(B, S, V)
    return layer_outputs, logits


# ----------------------------- pure-JAX reference -----------------------------

def _ref_rmsnorm(x, w, eps):
    v = jnp.mean(x.astype(jnp.float32) ** 2, -1, keepdims=True)
    return x * jax.lax.rsqrt(v + eps) * w


def _ref_block(h, lp, cos, sin, mask, cfg):
    B, S, D = h.shape
    H = cfg['n_heads']
    Hd = D // H
    xn = _ref_rmsnorm(h, lp['attn_norm'], cfg['norm_eps'])
    xq = (xn @ lp['wq']).reshape(B, S, H, Hd)
    xk = (xn @ lp['wk']).reshape(B, S, H, Hd)
    xv = (xn @ lp['wv']).reshape(B, S, H, Hd)

    def rot(x):
        xe, xo = x[..., 0::2], x[..., 1::2]
        c, s = cos[None, :, None, :], sin[None, :, None, :]
        return jnp.stack([xe * c - xo * s, xe * s + xo * c], -1).reshape(B, S, H, Hd)

    xq, xk = rot(xq), rot(xk)
    q = jnp.transpose(xq, (0, 2, 1, 3))
    k = jnp.transpose(xk, (0, 2, 1, 3))
    v = jnp.transpose(xv, (0, 2, 1, 3))
    scores = jnp.einsum('bhqd,bhkd->bhqk', q, k) / math.sqrt(Hd) + mask[None, None]
    p = jax.nn.softmax(scores, axis=-1)
    o = jnp.einsum('bhqk,bhkd->bhqd', p, v)
    o = jnp.transpose(o, (0, 2, 1, 3)).reshape(B, S, D)
    h = h + o @ lp['wo']
    hn = _ref_rmsnorm(h, lp['ffn_norm'], cfg['norm_eps'])
    return h + (jax.nn.silu(hn @ lp['w1']) * (hn @ lp['w3'])) @ lp['w2']


def ref_forward(tokens, start_pos, params, cfg, lateral_inputs=None):
    B, S = tokens.shape
    h = params['emb'][tokens]
    cos = params['freqs_cos'][start_pos:start_pos + S]
    sin = params['freqs_sin'][start_pos:start_pos + S]
    if S > 1:
        mask = jnp.triu(jnp.full((S, S + start_pos), -jnp.inf, jnp.float32),
                        k=1 + start_pos)
    else:
        mask = jnp.zeros((S, S + start_pos), jnp.float32)
    outs = []
    for i, lp in enumerate(params['layers']):
        if lateral_inputs is not None and i < len(lateral_inputs):
            h = h + lateral_inputs[i]
        h = _ref_block(h, lp, cos, sin, mask, cfg)
        outs.append(h)
    hn = _ref_rmsnorm(h, params['norm'], cfg['norm_eps'])
    return outs, hn @ params['output']


# ----------------------------- main -----------------------------

if __name__ == "__main__":
    cfg = dict(dim=64, n_layers=2, n_heads=4, vocab_size=128,
               hidden_dim=128, max_seq_len=16, norm_eps=1e-5)
    B, S = 2, 8

    params = init_params(jax.random.PRNGKey(0), cfg)
    prepped = prep_params(params, cfg)
    tokens = jax.random.randint(jax.random.PRNGKey(1), (B, S), 0, cfg['vocab_size'])
    lateral = [0.01 * jax.random.normal(jax.random.PRNGKey(2), (B, S, cfg['dim']),
                                        jnp.float32)]

    layer_outs, logits = transformer_column_forward(tokens, 0, prepped, cfg,
                                                    lateral_inputs=lateral)
    logits = jax.block_until_ready(logits)

    ref_outs, ref_logits = ref_forward(tokens, 0, params, cfg, lateral_inputs=lateral)

    assert logits.shape == (B, S, cfg['vocab_size'])
    assert len(layer_outs) == cfg['n_layers']
    assert bool(jnp.all(jnp.isfinite(logits)))
    assert jnp.allclose(logits, ref_logits, rtol=2e-2, atol=2e-2), "logits mismatch vs reference"
    assert jnp.allclose(layer_outs[-1], ref_outs[-1], rtol=2e-2, atol=2e-2), "layer output mismatch"

    print("KERNEL_OK")
</pallas_src>

<mosaic_0001>
module attributes {stable_mosaic.version = 11 : i64} {
  func.func @_rms_scale_kernel(%arg0: i32, %arg1: memref<16x64xf32, #tpu.memory_space<vmem>>, %arg2: memref<16x1xf32, #tpu.memory_space<vmem>>) attributes {dimension_semantics = [#tpu.dimension_semantics<parallel>], iteration_bounds = array<i64: 1>, scalar_prefetch = 0 : i64, scratch_operands = 0 : i64, tpu.core_type = #tpu.core_type<tc>, window_params = [{transform_indices = @transform_0, window_bounds = array<i64: 16, 64>}, {transform_indices = @transform_1, window_bounds = array<i64: 16, 1>}]} {
    %c0 = arith.constant 0 : index
    %c0_0 = arith.constant 0 : index
    %0 = vector.load %arg1[%c0, %c0_0] : memref<16x64xf32, #tpu.memory_space<vmem>>, vector<16x64xf32>
    %1 = arith.mulf %0, %0 : vector<16x64xf32>
    %cst = arith.constant dense<0.000000e+00> : vector<16xf32>
    %2 = vector.multi_reduction <add>, %1, %cst [1] : vector<16x64xf32> to vector<16xf32>
    %3 = vector.shape_cast %2 : vector<16xf32> to vector<16x1xf32>
    %cst_1 = arith.constant 6.400000e+01 : f32
    %4 = vector.broadcast %cst_1 : f32 to vector<16x1xf32>
    %5 = arith.divf %3, %4 : vector<16x1xf32>
    %cst_2 = arith.constant 9.99999974E-6 : f32
    %6 = vector.broadcast %cst_2 : f32 to vector<16x1xf32>
    %7 = arith.addf %5, %6 : vector<16x1xf32>
    %8 = math.rsqrt %7 : vector<16x1xf32>
    %c0_3 = arith.constant 0 : index
    %c0_4 = arith.constant 0 : index
    %9 = vector.load %arg2[%c0_3, %c0_4] : memref<16x1xf32, #tpu.memory_space<vmem>>, vector<16x1xf32>
    tpu.vector_store %arg2[%c0_3, %c0_4], %8 {strides = array<i32>} : memref<16x1xf32, #tpu.memory_space<vmem>>, vector<16x1xf32>,
    return
  }
  func.func @transform_0(%arg0: i32) -> (i32, i32) {
    %c0_i32 = arith.constant 0 : i32
    %c0_i32_0 = arith.constant 0 : i32
    return %arg0, %c0_i32 : i32, i32
  }
  func.func @transform_1(%arg0: i32) -> (i32, i32) {
    %c0_i32 = arith.constant 0 : i32
    %c0_i32_0 = arith.constant 0 : i32
    return %arg0, %c0_i32 : i32, i32
  }
}

</mosaic_0001>

<bundles_post_ra>
// kernel: tpu_custom_call.1
= control target key start
LH: loop header
LB: loop body
LE: loop exit
PB: predicated region body
PF: predicated region fallthrough
CT: control target
= control target key end

     0   :  { %6 = vsyncpa [#allocation3], 0  ;;  %s79_s6 = smov [#allocation2]   ;;  %s110_s0 = inlined_call_operand.hbm [shape: f32[16,64], index: 0, kind: input, shape index: {}]   ;;  %s111_s1 = inlined_call_operand.vmem [shape: f32[16,1], index: 1, kind: output, shape index: {}]  }
   0x1   :  { %s12_s7 = sshll.u32 %s79_s6, 4  ;;  %s55_s10 = scalar_lea.hbm %s110_s0, 256  ;;  %s13_s7 = int_to_ptr.vmem [resolvable:$true] %s12_s7 }
   0x2   :  { %p56_p0 = scmp.ne.s32.totalorder %s110_s0, %s55_s10  ;;  %p59_p1 = scmp.lt.u32.totalorder %s55_s10, %s110_s0 }
   0x4   :  { %p61_p2 = pnand %p59_p1, %p56_p0 }
   0x6   :  { %64 = shalt.err (!%p61_p2)
}
   0x7   :  { %s65_s15 = scalar_lea.vmem %s13_s7, 256  ;;  %p70_p4 = scmp.lt.s32.totalorder %s13_s7, %s13_s7 }
   0x8   :  { %p66_p3 = scmp.ne.s32.totalorder %s13_s7, %s65_s15  ;;  %p71_p5 = scmp.lt.s32.totalorder %s65_s15, %s65_s15 }
   0xa   :  { %p72_p6 = por %p71_p5, %p70_p4 }
   0xc   :  { %p73_p7 = pnand %p72_p6, %p66_p3 }
   0xe   :  { %76 = shalt.err (!%p73_p7)
}
   0xf   :  { %s80_s16 = smov 128   ;;  %s81_s17 = smov 8  }
  0x10   :  { %18 = dma.hbm_to_vmem [thread:$0]  %s110_s0, 256, %s13_s7, [#allocation3], %s80_s16, %s80_s16, %s81_s17  }
  0x11   :  { %77 = dma.done.wait [#allocation3], 256  }
  0x12   :  { %78 = vsyncadd [#allocation3], 4294967040  ;;  %v22_v0 = vld [vmem:[#allocation2] sm:$0xff]  ;;  %vm26_vm0 = vcmask 523264   ;;  %v23_v1 = vld [vmem:[#allocation2 + $0x8] sm:$0xff]  ;;  %vm40_vm1 = vcmask 7168  }
  0x13   :  { %v24_v2 = vmul.f32 %v22_v0, %v22_v0  ;;  %v25_v3 = vmul.f32 %v23_v1, %v23_v1 }
  0x15   :  { %v27_v4 = vsel %vm26_vm0, %v24_v2, 0.0  ;;  %v30_v5 = vsel %vm26_vm0, %v25_v3, 0.0 }
  0x16   :  { %28 = vadd.xlane.f32.xlu0 %v27_v4 }
  0x1a   :  { %31 = vadd.xlane.f32.xlu0 %v30_v5 }
  0xa3   :  { %v29_v6 = vpop.xlane.xlu0 %28 }
  0xa4   :  { %v34_v7 = vmul.f32 0.015625, %v29_v6 }
  0xa6   :  { %v36_v8 = vadd.f32 1e-05, %v34_v7 }
  0xa7   :  { %v32_v9 = vpop.xlane.xlu0 %31 }
  0xa8   :  { %51 = vrsqrt.f32 %v36_v8  ;;  %v35_v10 = vmul.f32 0.015625, %v32_v9 }
  0xaa   :  { %v37_v11 = vadd.f32 1e-05, %v35_v10 }
  0xac   :  { %53 = vrsqrt.f32 %v37_v11 }
  0xb2   :  { %v52_v12 = vpop.eup %51 }
  0xb3   :  { %41 = vst.msk [vmem:[%s111_s1] sm:$0xff] %vm40_vm1, %v52_v12 }
  0xb6   :  { %v54_v13 = vpop.eup %53 }
  0xb7   :  { %42 = vst.msk [vmem:[%s111_s1 + $0x8] sm:$0xff] %vm40_vm1, %v54_v13 }
  0xb8   :  { %47 = vsyncpa [#allocation3], 1 }

</bundles_post_ra>
